<compile_context>
chip_gen: v7x
topology: tpu7x:2x2x1
jax: 0.10.0
libtpu: 0.0.40
codegen_flags: <defaults>
</compile_context>

<pallas_src>
import numpy as np
import jax
import jax.numpy as jnp
from jax.experimental import pallas as pl
from jax.experimental.pallas import tpu as pltpu


# ----------------------------------------------------------------------------
# Host-side resampling matrices (match PyTorch semantics exactly)
# ----------------------------------------------------------------------------
def adaptive_avg_pool_matrix(in_size: int, out_size: int) -> np.ndarray:
    """P[o, i] such that (P @ v) == adaptive_avg_pool1d(v, out_size)."""
    P = np.zeros((out_size, in_size), np.float32)
    for o in range(out_size):
        start = (o * in_size) // out_size
        end = ((o + 1) * in_size + out_size - 1) // out_size  # ceil
        P[o, start:end] = 1.0 / float(end - start)
    return P


def bilinear_upsample_matrix(in_size: int, out_size: int) -> np.ndarray:
    """U[o, i] == F.interpolate(..., mode='bilinear', align_corners=False) along one axis."""
    U = np.zeros((out_size, in_size), np.float32)
    scale = in_size / out_size
    for o in range(out_size):
        src = max((o + 0.5) * scale - 0.5, 0.0)
        i0 = min(int(np.floor(src)), in_size - 1)
        i1 = min(i0 + 1, in_size - 1)
        lam = src - i0
        U[o, i0] += 1.0 - lam
        U[o, i1] += lam
    return U


def nearest_upsample_matrix(in_size: int, out_size: int) -> np.ndarray:
    """U[o, i] == F.interpolate(..., mode='nearest') along one axis."""
    U = np.zeros((out_size, in_size), np.float32)
    for o in range(out_size):
        i = min((o * in_size) // out_size, in_size - 1)
        U[o, i] = 1.0
    return U


def _round_up(v: int, m: int) -> int:
    return ((v + m - 1) // m) * m


def _pick_pixel_tile(n_pix: int, C: int, itemsize: int = 4) -> int:
    """Largest pixel tile (multiple of 128) whose x-tile stays <= ~4 MB (fits v7x 64 MiB
    VMEM with double-buffering) and whose pad waste is <= 12.5% of n_pix."""
    budget = 4 << 20
    cands = [t for t in (1024, 512, 256, 128) if t * C * itemsize <= budget] or [128]
    for t in cands:
        waste = _round_up(n_pix, t) - n_pix
        if waste == 0 or waste * 8 <= n_pix:
            return t
    return cands[-1]


def _vmem_limit(est_bytes: int) -> int:
    # explicit scoped-VMEM budget: 2x headroom over the static estimate, capped at v7x physical
    return int(min(64 << 20, max(2 * est_bytes, 16 << 20)))


# ----------------------------------------------------------------------------
# Kernel A: pooled^T (C, P) accumulated over pixel tiles  ->  concatenated branch
#           1x1 conv + BN + ReLU + block-diag mask  ->  stacked branch-slice of the
#           final 1x1 conv, all at the (tiny, padded-to-128) pooled resolution.
#           Output z^T: (N, out_dim, P_pad) bf16.
# ----------------------------------------------------------------------------
def _branch_pool_kernel(x_ref, kp_ref, wb_ref, bb_ref, mask_ref, wf_ref, z_ref, pooled_acc):
    m = pl.program_id(1)

    @pl.when(m == 0)
    def _():
        pooled_acc[...] = jnp.zeros_like(pooled_acc)

    # pooled^T (C, P) += x_tile (C, TM) @ kp_tile (TM, P); bf16 x bf16 -> f32 on the MXU.
    pooled_acc[...] += jnp.dot(x_ref[0].astype(jnp.bfloat16), kp_ref[...],
                               preferred_element_type=jnp.float32)

    @pl.when(m == pl.num_programs(1) - 1)
    def _():
        pooled_bf = pooled_acc[...].astype(jnp.bfloat16)                     # (C, P)
        # all-branch 1x1 conv + folded BN + ReLU at pooled resolution
        y = jnp.dot(wb_ref[...], pooled_bf, preferred_element_type=jnp.float32)  # (nb*cr, P)
        y = jnp.maximum(y + bb_ref[...], 0.0) * mask_ref[...]   # block-diag select + zero pad rows
        # stacked branch slice of the final 1x1 conv (block-diagonal via mask)
        z = jnp.dot(wf_ref[...], y.astype(jnp.bfloat16),
                    preferred_element_type=jnp.float32)                      # (out_dim, P)
        z_ref[0] = z.astype(z_ref.dtype)


def branch_pool_conv(xl, kp_t, wb_t, bb_t, mask_t, wf_t, tm, out_dim, single_buffer):
    """xl: (N, C, n_pix_pad); kp_t: (n_pix_pad, P_pad) bf16; wb_t: (nb*cr, C) bf16;
    bb_t: (nb*cr, 1) f32; mask_t: (nb*cr, P_pad) bf16; wf_t: (out_dim, nb*cr) bf16
    -> z^T: (N, out_dim, P_pad) bf16."""
    N, C, n_pix_pad = xl.shape
    P_pad = kp_t.shape[1]
    nbcr = wb_t.shape[0]
    n_mt = n_pix_pad // tm
    resident = dict(pipeline_mode=pl.Buffered(1)) if single_buffer else {}

    est = (2 * tm * C * xl.dtype.itemsize          # x tile, double-buffered
           + 2 * tm * P_pad * 2                    # kp tile
           + C * P_pad * 4                         # accumulator scratch
           + nbcr * C * 2 + nbcr * 4 + nbcr * P_pad * 2 + out_dim * nbcr * 2   # weights
           + 2 * out_dim * P_pad * 2)              # z output

    return pl.pallas_call(
        _branch_pool_kernel,
        out_shape=jax.ShapeDtypeStruct((N, out_dim, P_pad), jnp.bfloat16),
        grid=(N, n_mt),
        in_specs=[
            pl.BlockSpec((1, C, tm), lambda n, m: (n, 0, m)),
            pl.BlockSpec((tm, P_pad), lambda n, m: (m, 0)),
            pl.BlockSpec((nbcr, C), lambda n, m: (0, 0), **resident),        # resident
            pl.BlockSpec((nbcr, 1), lambda n, m: (0, 0), **resident),        # resident
            pl.BlockSpec((nbcr, P_pad), lambda n, m: (0, 0), **resident),    # resident
            pl.BlockSpec((out_dim, nbcr), lambda n, m: (0, 0), **resident),  # resident
        ],
        out_specs=pl.BlockSpec((1, out_dim, P_pad), lambda n, m: (n, 0, 0)),
        scratch_shapes=[pltpu.VMEM((C, P_pad), jnp.float32)],
        compiler_params=pltpu.CompilerParams(
            dimension_semantics=("parallel", "arbitrary"),
            vmem_limit_bytes=_vmem_limit(est)),
    )(xl, kp_t, wb_t, bb_t, mask_t, wf_t)


# ----------------------------------------------------------------------------
# Kernel C: out^T = relu(Wfx^T @ x_tile  +  z^T @ U_tile  +  b_fin), pixel-tiled,
#           everything in natural MXU orientation, NCHW output written directly.
# ----------------------------------------------------------------------------
def _fused_output_kernel(x_ref, u_ref, z_ref, wfx_ref, bf_ref, o_ref):
    xb = x_ref[0].astype(jnp.bfloat16)                                        # (C, TM)
    main = jnp.dot(wfx_ref[...], xb, preferred_element_type=jnp.float32)      # (out, TM)
    branch = jnp.dot(z_ref[0], u_ref[...], preferred_element_type=jnp.float32)  # (out, TM)
    o_ref[0] = jnp.maximum(main + branch + bf_ref[...], 0.0)


def fused_output(xl, u_t, z, wfx_t, bfin_t, tm, single_buffer):
    """xl: (N, C, n_pix_pad); u_t: (P_pad, n_pix_pad) bf16; z: (N, out_dim, P_pad) bf16;
    wfx_t: (out_dim, C) bf16; bfin_t: (out_dim, 1) f32 -> (N, out_dim, n_pix_pad) f32."""
    # TODO(synk): emit bf16 output here if the downstream consumer accepts it (halves writeback).
    N, C, n_pix_pad = xl.shape
    P_pad = u_t.shape[0]
    out_dim = wfx_t.shape[0]
    n_mt = n_pix_pad // tm
    resident = dict(pipeline_mode=pl.Buffered(1)) if single_buffer else {}

    est = (2 * tm * C * xl.dtype.itemsize + 2 * P_pad * tm * 2 + 2 * out_dim * P_pad * 2
           + out_dim * C * 2 + out_dim * 4 + 2 * out_dim * tm * 4)

    return pl.pallas_call(
        _fused_output_kernel,
        out_shape=jax.ShapeDtypeStruct((N, out_dim, n_pix_pad), jnp.float32),
        grid=(N, n_mt),
        in_specs=[
            pl.BlockSpec((1, C, tm), lambda n, m: (n, 0, m)),
            pl.BlockSpec((P_pad, tm), lambda n, m: (0, m)),
            pl.BlockSpec((1, out_dim, P_pad), lambda n, m: (n, 0, 0)),
            pl.BlockSpec((out_dim, C), lambda n, m: (0, 0), **resident),      # resident
            pl.BlockSpec((out_dim, 1), lambda n, m: (0, 0), **resident),      # resident
        ],
        out_specs=pl.BlockSpec((1, out_dim, tm), lambda n, m: (n, 0, m)),
        compiler_params=pltpu.CompilerParams(
            dimension_semantics=("parallel", "parallel"),
            vmem_limit_bytes=_vmem_limit(est)),
    )(xl, u_t, z, wfx_t, bfin_t)


# ----------------------------------------------------------------------------
# Parameter construction (deterministic, BN folded into the 1x1 conv weights)
# ----------------------------------------------------------------------------
def make_conv_bn_params(key, cin, cout, eps=1e-5):
    k1, k2, k3, k4, k5 = jax.random.split(key, 5)
    w = 0.1 * jax.random.normal(k1, (cin, cout), jnp.float32)      # Conv2d 1x1, bias=False
    gamma = 1.0 + 0.1 * jax.random.normal(k2, (cout,), jnp.float32)
    beta = 0.1 * jax.random.normal(k3, (cout,), jnp.float32)
    rmean = 0.1 * jax.random.normal(k4, (cout,), jnp.float32)
    rvar = jax.random.uniform(k5, (cout,), jnp.float32, minval=0.5, maxval=1.5)
    scale = gamma / jnp.sqrt(rvar + eps)
    w_fold = w * scale[None, :]
    b_fold = (beta - rmean * scale).reshape(1, cout)
    return w_fold, b_fold


class AdaptivePyramidPoolingModulePallas:
    def __init__(self, in_dim, out_dim, input_size, bins=(1, 2, 3, 6),
                 upsampling_mode='bilinear', key=None):
        self.in_dim = in_dim
        self.out_dim = out_dim
        self.input_size = input_size
        self.bins = tuple(bins)
        self.upsampling_mode = upsampling_mode
        nb = len(self.bins)
        self.reduction_dim = in_dim // nb
        cr = self.reduction_dim
        if key is None:
            key = jax.random.PRNGKey(0)
        keys = jax.random.split(key, nb + 1)

        wbs, bbs = [], []
        for i in range(nb):
            wf, bf = make_conv_bn_params(keys[i], in_dim, cr)
            wbs.append(wf.T)                                   # (cr, C)
            bbs.append(bf.T)                                   # (cr, 1)
        self.Wb_cat_t = jnp.concatenate(wbs, axis=0).astype(jnp.bfloat16)   # (nb*cr, C)
        self.bb_cat_t = jnp.concatenate(bbs, axis=0)                        # (nb*cr, 1) f32

        cin_last = in_dim + cr * nb
        wfin, bfin = make_conv_bn_params(keys[-1], cin_last, out_dim)
        # Split the folded final weight by concat-channel block: [x | branch_1 | ... | branch_nb]
        self.Wfx_t = wfin[:in_dim].T.astype(jnp.bfloat16)                    # (out_dim, C)
        self.Wf_stack_t = wfin[in_dim:].T.astype(jnp.bfloat16)               # (out_dim, nb*cr)
        self.bfin_t = bfin.T                                                 # (out_dim, 1) f32

        self._single_buffer_weights = True   # pl.Buffered(1); falls back if unsupported
        self._mats_cache = {}

    # -- pooling / upsampling kron matrices + block-diagonal branch mask, pre-transposed --
    def _resample_mats(self, H, W, n_pix_pad):
        ck = (H, W, n_pix_pad)
        if ck in self._mats_cache:
            return self._mats_cache[ck]
        h_inp, w_inp = self.input_size
        # guard against rounding to 0 (PyTorch would simply crash in that case)
        mh = max(1, int(H / h_inp + 0.5))
        mw = max(1, int(W / w_inp + 0.5))
        nb = len(self.bins)
        cr = self.reduction_dim
        n_pix = H * W

        blocks, off = [], 0
        for b in self.bins:
            hp, wp = b * mh, b * mw
            blocks.append((off, hp, wp))
            off += hp * wp
        P_tot = off
        P_pad = _round_up(max(P_tot, 1), 128)    # lane-dense pooled axis everywhere

        kp_t = np.zeros((n_pix_pad, P_pad), np.float32)    # pooled^T = x @ kp_t
        u_t = np.zeros((P_pad, n_pix_pad), np.float32)     # up^T = z^T @ u_t
        mask = np.zeros((nb * cr, P_pad), np.float32)      # block-diag branch select + pad zeroing
        for i, (off_i, hp, wp) in enumerate(blocks):
            rows = hp * wp
            ph = adaptive_avg_pool_matrix(H, hp)
            pw = adaptive_avg_pool_matrix(W, wp)
            kp_t[:n_pix, off_i:off_i + rows] = np.kron(ph, pw).T
            if self.upsampling_mode == 'bilinear':
                uh = bilinear_upsample_matrix(hp, H)
                uw = bilinear_upsample_matrix(wp, W)
            elif self.upsampling_mode == 'nearest':
                uh = nearest_upsample_matrix(hp, H)
                uw = nearest_upsample_matrix(wp, W)
            else:
                raise NotImplementedError(
                    f"Only nearest and bilinear interpolation are supported. "
                    f"Got: {self.upsampling_mode}")
            u_t[off_i:off_i + rows, :n_pix] = np.kron(uh, uw).T
            mask[i * cr:(i + 1) * cr, off_i:off_i + rows] = 1.0

        res = (jnp.asarray(kp_t).astype(jnp.bfloat16),
               jnp.asarray(u_t).astype(jnp.bfloat16),
               jnp.asarray(mask).astype(jnp.bfloat16))
        self._mats_cache[ck] = res
        return res

    def __call__(self, x):
        """x: (N, C, H, W) float32 -> (N, out_dim, H, W) float32.  NCHW in, NCHW out;
        no boundary transpose passes."""
        N, C, H, W = x.shape
        n_pix = H * W
        tm = _pick_pixel_tile(n_pix, C, x.dtype.itemsize)
        n_pix_pad = _round_up(n_pix, tm)
        xl = x.reshape(N, C, n_pix)
        if n_pix_pad != n_pix:
            xl = jnp.pad(xl, ((0, 0), (0, 0), (0, n_pix_pad - n_pix)))
        kp_t, u_t, mask_t = self._resample_mats(H, W, n_pix_pad)

        def run(single_buffer):
            z = branch_pool_conv(xl, kp_t, self.Wb_cat_t, self.bb_cat_t, mask_t,
                                 self.Wf_stack_t, tm, self.out_dim, single_buffer)
            return fused_output(xl, u_t, z, self.Wfx_t, self.bfin_t, tm, single_buffer)

        try:
            out = run(self._single_buffer_weights)
        except Exception:
            if not self._single_buffer_weights:
                raise
            # pipeline_mode=pl.Buffered(1) unsupported on this jax/Mosaic build -> default buffering
            self._single_buffer_weights = False
            out = run(False)

        return out[..., :n_pix].reshape(N, self.out_dim, H, W)

    # -- pure-JAX reference with identical math and identical bf16 operand quantization --
    def reference(self, x):
        N, C, H, W = x.shape
        n_pix = H * W
        tm = _pick_pixel_tile(n_pix, C, x.dtype.itemsize)
        n_pix_pad = _round_up(n_pix, tm)
        kp_t, u_t, mask_t = self._resample_mats(H, W, n_pix_pad)

        xq = x.astype(jnp.bfloat16).astype(jnp.float32).reshape(N, C, n_pix)
        if n_pix_pad != n_pix:
            xq = jnp.pad(xq, ((0, 0), (0, 0), (0, n_pix_pad - n_pix)))
        kpf = kp_t.astype(jnp.float32)
        uf = u_t.astype(jnp.float32)
        mf = mask_t.astype(jnp.float32)

        pooled = jnp.einsum('nck,kp->ncp', xq, kpf)
        pooled = pooled.astype(jnp.bfloat16).astype(jnp.float32)
        y = jnp.maximum(jnp.einsum('rc,ncp->nrp', self.Wb_cat_t.astype(jnp.float32), pooled)
                        + self.bb_cat_t[None], 0.0) * mf[None]
        y = y.astype(jnp.bfloat16).astype(jnp.float32)
        z = jnp.einsum('or,nrp->nop', self.Wf_stack_t.astype(jnp.float32), y)
        z = z.astype(jnp.bfloat16).astype(jnp.float32)
        main = jnp.einsum('oc,nck->nok', self.Wfx_t.astype(jnp.float32), xq)
        branch = jnp.einsum('nop,pk->nok', z, uf)
        out = jnp.maximum(main + branch + self.bfin_t[None], 0.0)
        return out[..., :n_pix].reshape(N, self.out_dim, H, W)


if __name__ == "__main__":
    key = jax.random.PRNGKey(0)
    kx, kparam = jax.random.split(key)

    N, C, H, W = 2, 8, 16, 16
    out_dim = 8
    x = jax.random.normal(kx, (N, C, H, W), dtype=jnp.float32)

    module = AdaptivePyramidPoolingModulePallas(
        in_dim=C, out_dim=out_dim, input_size=(16, 16), bins=(1, 2, 3, 6), key=kparam)

    out = jax.block_until_ready(module(x))
    assert out.shape == (N, out_dim, H, W), out.shape

    ref = jax.block_until_ready(module.reference(x))
    np.testing.assert_allclose(np.asarray(out), np.asarray(ref), rtol=2e-3, atol=2e-3)

    print("KERNEL_OK")
</pallas_src>

<mosaic_0001>
module attributes {stable_mosaic.version = 11 : i64} {
  func.func @_branch_pool_kernel(%arg0: i32, %arg1: i32, %arg2: memref<1x8x256xf32, #tpu.memory_space<vmem>>, %arg3: memref<256x128xbf16, #tpu.memory_space<vmem>>, %arg4: memref<8x8xbf16, #tpu.memory_space<vmem>>, %arg5: memref<8x1xf32, #tpu.memory_space<vmem>>, %arg6: memref<8x128xbf16, #tpu.memory_space<vmem>>, %arg7: memref<8x8xbf16, #tpu.memory_space<vmem>>, %arg8: memref<1x8x128xbf16, #tpu.memory_space<vmem>>, %arg9: memref<8x128xf32, #tpu.memory_space<vmem>>) attributes {dimension_semantics = [#tpu.dimension_semantics<parallel>, #tpu.dimension_semantics<arbitrary>], iteration_bounds = array<i64: 2, 1>, scalar_prefetch = 0 : i64, scratch_operands = 1 : i64, tpu.core_type = #tpu.core_type<tc>, window_params = [{transform_indices = @transform_0, window_bounds = array<i64: 1, 8, 256>}, {transform_indices = @transform_1, window_bounds = array<i64: 256, 128>}, {pipeline_mode = #tpu.pipeline_mode<synchronous>, transform_indices = @transform_2, window_bounds = array<i64: 8, 8>}, {pipeline_mode = #tpu.pipeline_mode<synchronous>, transform_indices = @transform_3, window_bounds = array<i64: 8, 1>}, {pipeline_mode = #tpu.pipeline_mode<synchronous>, transform_indices = @transform_4, window_bounds = array<i64: 8, 128>}, {pipeline_mode = #tpu.pipeline_mode<synchronous>, transform_indices = @transform_5, window_bounds = array<i64: 8, 8>}, {transform_indices = @transform_6, window_bounds = array<i64: 1, 8, 128>}]} {
    %c0_i32 = arith.constant 0 : i32
    %0 = arith.cmpi eq, %arg1, %c0_i32 : i32
    %1 = arith.extui %0 : i1 to i32
    %c0_i32_0 = arith.constant 0 : i32
    %2 = arith.cmpi ne, %1, %c0_i32_0 : i32
    scf.if %2 {
      %cst_11 = arith.constant 0.000000e+00 : f32
      %14 = vector.broadcast %cst_11 : f32 to vector<8x128xf32>
      %c0_12 = arith.constant 0 : index
      %c0_13 = arith.constant 0 : index
      %15 = vector.load %arg9[%c0_12, %c0_13] : memref<8x128xf32, #tpu.memory_space<vmem>>, vector<8x128xf32>
      tpu.vector_store %arg9[%c0_12, %c0_13], %14 {strides = array<i32>} : memref<8x128xf32, #tpu.memory_space<vmem>>, vector<8x128xf32>,
    } else {
    }
    %c0 = arith.constant 0 : index
    %c0_1 = arith.constant 0 : index
    %3 = vector.load %arg9[%c0, %c0_1] : memref<8x128xf32, #tpu.memory_space<vmem>>, vector<8x128xf32>
    %c0_2 = arith.constant 0 : index
    %c0_3 = arith.constant 0 : index
    %c0_4 = arith.constant 0 : index
    %4 = vector.load %arg2[%c0_2, %c0_3, %c0_4] : memref<1x8x256xf32, #tpu.memory_space<vmem>>, vector<1x8x256xf32>
    %5 = vector.shape_cast %4 : vector<1x8x256xf32> to vector<8x256xf32>
    %6 = arith.truncf %5 : vector<8x256xf32> to vector<8x256xbf16>
    %c0_5 = arith.constant 0 : index
    %c0_6 = arith.constant 0 : index
    %7 = vector.load %arg3[%c0_5, %c0_6] : memref<256x128xbf16, #tpu.memory_space<vmem>>, vector<256x128xbf16>
    %cst = arith.constant dense<0.000000e+00> : vector<8x128xf32>
    %8 = tpu.matmul %6, %7, %cst {dimension_numbers = #tpu.dot_dimension_numbers<[1], [0], [0], [1], [0, 0, 1, 1], [], []>} : vector<8x256xbf16>, vector<256x128xbf16>, vector<8x128xf32> -> vector<8x128xf32>
    %9 = arith.addf %3, %8 : vector<8x128xf32>
    %c0_7 = arith.constant 0 : index
    %c0_8 = arith.constant 0 : index
    %10 = vector.load %arg9[%c0_7, %c0_8] : memref<8x128xf32, #tpu.memory_space<vmem>>, vector<8x128xf32>
    tpu.vector_store %arg9[%c0_7, %c0_8], %9 {strides = array<i32>} : memref<8x128xf32, #tpu.memory_space<vmem>>, vector<8x128xf32>,
    %c0_i32_9 = arith.constant 0 : i32
    %11 = arith.cmpi eq, %arg1, %c0_i32_9 : i32
    %12 = arith.extui %11 : i1 to i32
    %c0_i32_10 = arith.constant 0 : i32
    %13 = arith.cmpi ne, %12, %c0_i32_10 : i32
    scf.if %13 {
      %c0_11 = arith.constant 0 : index
      %c0_12 = arith.constant 0 : index
      %14 = vector.load %arg9[%c0_11, %c0_12] : memref<8x128xf32, #tpu.memory_space<vmem>>, vector<8x128xf32>
      %15 = arith.truncf %14 : vector<8x128xf32> to vector<8x128xbf16>
      %c0_13 = arith.constant 0 : index
      %c0_14 = arith.constant 0 : index
      %16 = vector.load %arg4[%c0_13, %c0_14] : memref<8x8xbf16, #tpu.memory_space<vmem>>, vector<8x8xbf16>
      %cst_15 = arith.constant dense<0.000000e+00> : vector<8x128xf32>
      %17 = tpu.matmul %16, %15, %cst_15 {dimension_numbers = #tpu.dot_dimension_numbers<[1], [0], [0], [1], [0, 0, 1, 1], [], []>} : vector<8x8xbf16>, vector<8x128xbf16>, vector<8x128xf32> -> vector<8x128xf32>
      %c0_16 = arith.constant 0 : index
      %c0_17 = arith.constant 0 : index
      %18 = vector.load %arg5[%c0_16, %c0_17] : memref<8x1xf32, #tpu.memory_space<vmem>>, vector<8x1xf32>
      %19 = vector.broadcast %18 : vector<8x1xf32> to vector<8x128xf32>
      %20 = arith.addf %17, %19 : vector<8x128xf32>
      %cst_18 = arith.constant 0.000000e+00 : f32
      %21 = vector.broadcast %cst_18 : f32 to vector<8x128xf32>
      %22 = arith.maximumf %20, %21 : vector<8x128xf32>
      %c0_19 = arith.constant 0 : index
      %c0_20 = arith.constant 0 : index
      %23 = vector.load %arg6[%c0_19, %c0_20] : memref<8x128xbf16, #tpu.memory_space<vmem>>, vector<8x128xbf16>
      %24 = arith.extf %23 : vector<8x128xbf16> to vector<8x128xf32>
      %25 = arith.mulf %22, %24 : vector<8x128xf32>
      %c0_21 = arith.constant 0 : index
      %c0_22 = arith.constant 0 : index
      %26 = vector.load %arg7[%c0_21, %c0_22] : memref<8x8xbf16, #tpu.memory_space<vmem>>, vector<8x8xbf16>
      %27 = arith.truncf %25 : vector<8x128xf32> to vector<8x128xbf16>
      %cst_23 = arith.constant dense<0.000000e+00> : vector<8x128xf32>
      %28 = tpu.matmul %26, %27, %cst_23 {dimension_numbers = #tpu.dot_dimension_numbers<[1], [0], [0], [1], [0, 0, 1, 1], [], []>} : vector<8x8xbf16>, vector<8x128xbf16>, vector<8x128xf32> -> vector<8x128xf32>
      %29 = arith.truncf %28 : vector<8x128xf32> to vector<8x128xbf16>
      %c0_24 = arith.constant 0 : index
      %c0_25 = arith.constant 0 : index
      %c0_26 = arith.constant 0 : index
      %30 = vector.load %arg8[%c0_24, %c0_25, %c0_26] : memref<1x8x128xbf16, #tpu.memory_space<vmem>>, vector<1x8x128xbf16>
      %31 = vector.shape_cast %30 : vector<1x8x128xbf16> to vector<8x128xbf16>
      %32 = vector.shape_cast %29 : vector<8x128xbf16> to vector<1x8x128xbf16>
      tpu.vector_store %arg8[%c0_24, %c0_25, %c0_26], %32 {strides = array<i32>} : memref<1x8x128xbf16, #tpu.memory_space<vmem>>, vector<1x8x128xbf16>,
    } else {
    }
    return
  }
  func.func @transform_0(%arg0: i32, %arg1: i32) -> (i32, i32, i32) {
    %c0_i32 = arith.constant 0 : i32
    %c0_i32_0 = arith.constant 0 : i32
    return %arg0, %c0_i32, %arg1 : i32, i32, i32
  }
  func.func @transform_1(%arg0: i32, %arg1: i32) -> (i32, i32) {
    %c0_i32 = arith.constant 0 : i32
    %c0_i32_0 = arith.constant 0 : i32
    return %arg1, %c0_i32 : i32, i32
  }
  func.func @transform_2(%arg0: i32, %arg1: i32) -> (i32, i32) {
    %c0_i32 = arith.constant 0 : i32
    %c0_i32_0 = arith.constant 0 : i32
    %c0_i32_1 = arith.constant 0 : i32
    return %c0_i32, %c0_i32_0 : i32, i32
  }
  func.func @transform_3(%arg0: i32, %arg1: i32) -> (i32, i32) {
    %c0_i32 = arith.constant 0 : i32
    %c0_i32_0 = arith.constant 0 : i32
    %c0_i32_1 = arith.constant 0 : i32
    return %c0_i32, %c0_i32_0 : i32, i32
  }
  func.func @transform_4(%arg0: i32, %arg1: i32) -> (i32, i32) {
    %c0_i32 = arith.constant 0 : i32
    %c0_i32_0 = arith.constant 0 : i32
    %c0_i32_1 = arith.constant 0 : i32
    return %c0_i32, %c0_i32_0 : i32, i32
  }
  func.func @transform_5(%arg0: i32, %arg1: i32) -> (i32, i32) {
    %c0_i32 = arith.constant 0 : i32
    %c0_i32_0 = arith.constant 0 : i32
    %c0_i32_1 = arith.constant 0 : i32
    return %c0_i32, %c0_i32_0 : i32, i32
  }
  func.func @transform_6(%arg0: i32, %arg1: i32) -> (i32, i32, i32) {
    %c0_i32 = arith.constant 0 : i32
    %c0_i32_0 = arith.constant 0 : i32
    %c0_i32_1 = arith.constant 0 : i32
    return %arg0, %c0_i32, %c0_i32_0 : i32, i32, i32
  }
}

module attributes {stable_mosaic.version = 11 : i64} {
  func.func @_branch_pool_kernel(%arg0: i32, %arg1: i32, %arg2: memref<1x8x256xf32, #tpu.memory_space<vmem>>, %arg3: memref<256x128xbf16, #tpu.memory_space<vmem>>, %arg4: memref<8x8xbf16, #tpu.memory_space<vmem>>, %arg5: memref<8x1xf32, #tpu.memory_space<vmem>>, %arg6: memref<8x128xbf16, #tpu.memory_space<vmem>>, %arg7: memref<8x8xbf16, #tpu.memory_space<vmem>>, %arg8: memref<1x8x128xbf16, #tpu.memory_space<vmem>>, %arg9: memref<8x128xf32, #tpu.memory_space<vmem>>) attributes {dimension_semantics = [#tpu.dimension_semantics<parallel>, #tpu.dimension_semantics<arbitrary>], iteration_bounds = array<i64: 2, 1>, scalar_prefetch = 0 : i64, scratch_operands = 1 : i64, tpu.core_type = #tpu.core_type<tc>, window_params = [{transform_indices = @transform_0, window_bounds = array<i64: 1, 8, 256>}, {transform_indices = @transform_1, window_bounds = array<i64: 256, 128>}, {pipeline_mode = #tpu.pipeline_mode<synchronous>, transform_indices = @transform_2, window_bounds = array<i64: 8, 8>}, {pipeline_mode = #tpu.pipeline_mode<synchronous>, transform_indices = @transform_3, window_bounds = array<i64: 8, 1>}, {pipeline_mode = #tpu.pipeline_mode<synchronous>, transform_indices = @transform_4, window_bounds = array<i64: 8, 128>}, {pipeline_mode = #tpu.pipeline_mode<synchronous>, transform_indices = @transform_5, window_bounds = array<i64: 8, 8>}, {transform_indices = @transform_6, window_bounds = array<i64: 1, 8, 128>}]} {
    %c0_i32 = arith.constant 0 : i32
    %0 = arith.cmpi eq, %arg1, %c0_i32 : i32
    %1 = arith.extui %0 : i1 to i32
    %c0_i32_0 = arith.constant 0 : i32
    %2 = arith.cmpi ne, %1, %c0_i32_0 : i32
    scf.if %2 {
      %cst_11 = arith.constant 0.000000e+00 : f32
      %14 = vector.broadcast %cst_11 : f32 to vector<8x128xf32>
      %c0_12 = arith.constant 0 : index
      %c0_13 = arith.constant 0 : index
      %15 = vector.load %arg9[%c0_12, %c0_13] : memref<8x128xf32, #tpu.memory_space<vmem>>, vector<8x128xf32>
      tpu.vector_store %arg9[%c0_12, %c0_13], %14 {strides = array<i32>} : memref<8x128xf32, #tpu.memory_space<vmem>>, vector<8x128xf32>,
    } else {
    }
    %c0 = arith.constant 0 : index
    %c0_1 = arith.constant 0 : index
    %3 = vector.load %arg9[%c0, %c0_1] : memref<8x128xf32, #tpu.memory_space<vmem>>, vector<8x128xf32>
    %c0_2 = arith.constant 0 : index
    %c0_3 = arith.constant 0 : index
    %c0_4 = arith.constant 0 : index
    %4 = vector.load %arg2[%c0_2, %c0_3, %c0_4] : memref<1x8x256xf32, #tpu.memory_space<vmem>>, vector<1x8x256xf32>
    %5 = vector.shape_cast %4 : vector<1x8x256xf32> to vector<8x256xf32>
    %6 = arith.truncf %5 : vector<8x256xf32> to vector<8x256xbf16>
    %c0_5 = arith.constant 0 : index
    %c0_6 = arith.constant 0 : index
    %7 = vector.load %arg3[%c0_5, %c0_6] : memref<256x128xbf16, #tpu.memory_space<vmem>>, vector<256x128xbf16>
    %cst = arith.constant dense<0.000000e+00> : vector<8x128xf32>
    %8 = tpu.matmul %6, %7, %cst {dimension_numbers = #tpu.dot_dimension_numbers<[1], [0], [0], [1], [0, 0, 1, 1], [], []>} : vector<8x256xbf16>, vector<256x128xbf16>, vector<8x128xf32> -> vector<8x128xf32>
    %9 = arith.addf %3, %8 : vector<8x128xf32>
    %c0_7 = arith.constant 0 : index
    %c0_8 = arith.constant 0 : index
    %10 = vector.load %arg9[%c0_7, %c0_8] : memref<8x128xf32, #tpu.memory_space<vmem>>, vector<8x128xf32>
    tpu.vector_store %arg9[%c0_7, %c0_8], %9 {strides = array<i32>} : memref<8x128xf32, #tpu.memory_space<vmem>>, vector<8x128xf32>,
    %c0_i32_9 = arith.constant 0 : i32
    %11 = arith.cmpi eq, %arg1, %c0_i32_9 : i32
    %12 = arith.extui %11 : i1 to i32
    %c0_i32_10 = arith.constant 0 : i32
    %13 = arith.cmpi ne, %12, %c0_i32_10 : i32
    scf.if %13 {
      %c0_11 = arith.constant 0 : index
      %c0_12 = arith.constant 0 : index
      %14 = vector.load %arg9[%c0_11, %c0_12] : memref<8x128xf32, #tpu.memory_space<vmem>>, vector<8x128xf32>
      %15 = arith.truncf %14 : vector<8x128xf32> to vector<8x128xbf16>
      %c0_13 = arith.constant 0 : index
      %c0_14 = arith.constant 0 : index
      %16 = vector.load %arg4[%c0_13, %c0_14] : memref<8x8xbf16, #tpu.memory_space<vmem>>, vector<8x8xbf16>
      %cst_15 = arith.constant dense<0.000000e+00> : vector<8x128xf32>
      %17 = tpu.matmul %16, %15, %cst_15 {dimension_numbers = #tpu.dot_dimension_numbers<[1], [0], [0], [1], [0, 0, 1, 1], [], []>} : vector<8x8xbf16>, vector<8x128xbf16>, vector<8x128xf32> -> vector<8x128xf32>
      %c0_16 = arith.constant 0 : index
      %c0_17 = arith.constant 0 : index
      %18 = vector.load %arg5[%c0_16, %c0_17] : memref<8x1xf32, #tpu.memory_space<vmem>>, vector<8x1xf32>
      %19 = vector.broadcast %18 : vector<8x1xf32> to vector<8x128xf32>
      %20 = arith.addf %17, %19 : vector<8x128xf32>
      %cst_18 = arith.constant 0.000000e+00 : f32
      %21 = vector.broadcast %cst_18 : f32 to vector<8x128xf32>
      %22 = arith.maximumf %20, %21 : vector<8x128xf32>
      %c0_19 = arith.constant 0 : index
      %c0_20 = arith.constant 0 : index
      %23 = vector.load %arg6[%c0_19, %c0_20] : memref<8x128xbf16, #tpu.memory_space<vmem>>, vector<8x128xbf16>
      %24 = arith.extf %23 : vector<8x128xbf16> to vector<8x128xf32>
      %25 = arith.mulf %22, %24 : vector<8x128xf32>
      %c0_21 = arith.constant 0 : index
      %c0_22 = arith.constant 0 : index
      %26 = vector.load %arg7[%c0_21, %c0_22] : memref<8x8xbf16, #tpu.memory_space<vmem>>, vector<8x8xbf16>
      %27 = arith.truncf %25 : vector<8x128xf32> to vector<8x128xbf16>
      %cst_23 = arith.constant dense<0.000000e+00> : vector<8x128xf32>
      %28 = tpu.matmul %26, %27, %cst_23 {dimension_numbers = #tpu.dot_dimension_numbers<[1], [0], [0], [1], [0, 0, 1, 1], [], []>} : vector<8x8xbf16>, vector<8x128xbf16>, vector<8x128xf32> -> vector<8x128xf32>
      %29 = arith.truncf %28 : vector<8x128xf32> to vector<8x128xbf16>
      %c0_24 = arith.constant 0 : index
      %c0_25 = arith.constant 0 : index
      %c0_26 = arith.constant 0 : index
      %30 = vector.load %arg8[%c0_24, %c0_25, %c0_26] : memref<1x8x128xbf16, #tpu.memory_space<vmem>>, vector<1x8x128xbf16>
      %31 = vector.shape_cast %30 : vector<1x8x128xbf16> to vector<8x128xbf16>
      %32 = vector.shape_cast %29 : vector<8x128xbf16> to vector<1x8x128xbf16>
      tpu.vector_store %arg8[%c0_24, %c0_25, %c0_26], %32 {strides = array<i32>} : memref<1x8x128xbf16, #tpu.memory_space<vmem>>, vector<1x8x128xbf16>,
    } else {
    }
    return
  }
  func.func @transform_0(%arg0: i32, %arg1: i32) -> (i32, i32, i32) {
    %c0_i32 = arith.constant 0 : i32
    %c0_i32_0 = arith.constant 0 : i32
    return %arg0, %c0_i32, %arg1 : i32, i32, i32
  }
  func.func @transform_1(%arg0: i32, %arg1: i32) -> (i32, i32) {
    %c0_i32 = arith.constant 0 : i32
    %c0_i32_0 = arith.constant 0 : i32
    return %arg1, %c0_i32 : i32, i32
  }
  func.func @transform_2(%arg0: i32, %arg1: i32) -> (i32, i32) {
    %c0_i32 = arith.constant 0 : i32
    %c0_i32_0 = arith.constant 0 : i32
    %c0_i32_1 = arith.constant 0 : i32
    return %c0_i32, %c0_i32_0 : i32, i32
  }
  func.func @transform_3(%arg0: i32, %arg1: i32) -> (i32, i32) {
    %c0_i32 = arith.constant 0 : i32
    %c0_i32_0 = arith.constant 0 : i32
    %c0_i32_1 = arith.constant 0 : i32
    return %c0_i32, %c0_i32_0 : i32, i32
  }
  func.func @transform_4(%arg0: i32, %arg1: i32) -> (i32, i32) {
    %c0_i32 = arith.constant 0 : i32
    %c0_i32_0 = arith.constant 0 : i32
    %c0_i32_1 = arith.constant 0 : i32
    return %c0_i32, %c0_i32_0 : i32, i32
  }
  func.func @transform_5(%arg0: i32, %arg1: i32) -> (i32, i32) {
    %c0_i32 = arith.constant 0 : i32
    %c0_i32_0 = arith.constant 0 : i32
    %c0_i32_1 = arith.constant 0 : i32
    return %c0_i32, %c0_i32_0 : i32, i32
  }
  func.func @transform_6(%arg0: i32, %arg1: i32) -> (i32, i32, i32) {
    %c0_i32 = arith.constant 0 : i32
    %c0_i32_0 = arith.constant 0 : i32
    %c0_i32_1 = arith.constant 0 : i32
    return %arg0, %c0_i32, %c0_i32_0 : i32, i32, i32
  }
}

</mosaic_0001>

<bundles_post_ra>
// kernel: tpu_custom_call.1
= control target key start
LH: loop header
LB: loop body
LE: loop exit
PB: predicated region body
PF: predicated region fallthrough
CT: control target
= control target key end

     0   :  { %s1305_s0 = inlined_call_operand.hbm [shape: f32[2,8,256], index: 0, kind: input, shape index: {}]   ;;  %s1306_s1 = inlined_call_operand.hbm [shape: bf16[256,128], index: 1, kind: input, shape index: {}]   ;;  %s1307_s2 = inlined_call_operand.vmem [shape: bf16[8,8], index: 2, kind: input, shape index: {}]   ;;  %s1308_s3 = inlined_call_operand.vmem [shape: f32[8,1], index: 3, kind: input, shape index: {}]   ;;  %s1309_s4 = inlined_call_operand.vmem [shape: bf16[8,128], index: 4, kind: input, shape index: {}]   ;;  %s1310_s5 = inlined_call_operand.vmem [shape: bf16[8,8], index: 5, kind: input, shape index: {}]   ;;  %s1311_s6 = inlined_call_operand.hbm [shape: bf16[2,8,128], index: 6, kind: output, shape index: {}]  }
   0x1   :  { %1316 = sst [smem:[#allocation12_spill]] %s1306_s1 }
   0x2   :  { %11 = vsyncpa [#allocation4], 0 }
   0x3   :  { %13 = vsyncpa [#allocation4 + $0x1], 0 }
   0x4   :  { %14 = vsyncpa [#allocation7], 0 }
   0x5   :  { %15 = vsyncpa [#allocation5], 0 }
   0x6   :  { %17 = vsyncpa [#allocation5 + $0x1], 0  ;;  %s1068_s21 = smov 0   ;;  %s1070_s22 = smov 0  }
   0x7   :  { %s1072_s23 = smov 0   ;;  %s1074_s24 = smov 0  }
   0x8   :  { %s1076_s25 = smov 0   ;;  %s1078_s26 = smov 0  }
   0x9 LB: > { %s711_s27 = sadd.s32 4294967295, %s1023_s26   ;;  %s712_s28 = sadd.s32 4294967294, %s1023_s26   ;;  %s1023_s26 = sphi %s1078_s26, %s23_s26   ;;  %s1019_s25 = sphi %s1076_s25, %s1337_s25   ;;  %s1015_s24 = sphi %s1074_s24, %s1336_s24   ;;  %s1011_s23 = sphi %s1072_s23, %s1335_s23   ;;  %s1007_s22 = sphi %s1070_s22, %s1334_s22   ;;  %s1003_s21 = sphi %s1068_s21, %s1333_s21  }
   0xa   : > { %p57_p0 = scmp.ne.s32.totalorder %s1007_s22, %s1003_s21  ;;  %p1102_p1 = scmp.eq.s32.totalorder %s711_s27, 0 }
   0xb   : > { %p1106_p2 = scmp.eq.s32.totalorder %s711_s27, 1  ;;  %p197_p3 = scmp.eq.s32.totalorder %s712_s28, 1 }
   0xc   : > { %s1317_s29 = scalar_select %p1102_p1, 1, 0 }
   0xd   : > { %s1318_s30 = scalar_select %p1106_p2, 1, 0 }
   0xe   : > { %p1112_p4 = por %p1102_p1, %p57_p0  ;;  %p713_p5 = scmp.ge.s32.totalorder %s1023_s26, 1 }
   0xf   : > { %p1117_p6 = por %p197_p3, %p57_p0  ;;  %p204_p7 = scmp.lt.s32.totalorder %s1023_s26, 3 }
  0x10   : > { %s1319_s7 = scalar_select %p1112_p4, 1, 0 }
  0x11   : > { %s1320_s8 = scalar_select %p1117_p6, 1, 0 }
  0x12   : > { %p1122_p8 = pnand %p713_p5, %p204_p7  ;;  %s1025_s10 = smov [#allocation6]  }
  0x13   : > { %s219_s11 = sshll.u32 %s1025_s10, 4  ;;  %s35_s13 = sadd.s32 1, %s1019_s25  ;;  %s220_s11 = int_to_ptr.vmem [resolvable:$true] %s219_s11 }
  0x14   : > { %s1321_s9 = scalar_select %p1122_p8, 1, 0 }
  0x15   : > { %p792_p9 = pneg %p1122_p8  ;;  %s1323_s1 = sld [smem:[#allocation12_spill]] }
  0x17   : > { %p1131_p11 = pnand %p792_p9, %p1102_p1 }
  0x19   : > { %p881_p13 = pneg %p1131_p11 }
  0x1b   : > { %s879_s16 = scalar_lea.hbm %s1323_s1, 2048 }
  0x1c   : > { %p880_p12 = scmp.ne.s32.totalorder %s1323_s1, %s879_s16  ;;  %p886_p5 = scmp.lt.u32.totalorder %s879_s16, %s1323_s1 }
  0x1e   : > { %p882_p0 = pnand %p881_p13, %p880_p12 }
  0x20   : > { %p883_p3 = pneg %p882_p0 }
  0x22   : > { %p888_p7 = pnand %p886_p5, %p883_p3 }
  0x24   : > { %891 = shalt.err (!%p888_p7)
}
  0x25   : > { %s892_s27 = scalar_lea.vmem %s220_s11, 2048  ;;  %p900_p1 = scmp.lt.s32.totalorder %s220_s11, %s220_s11 }
  0x26   : > { %p893_p9 = scmp.ne.s32.totalorder %s220_s11, %s892_s27  ;;  %p901_p4 = scmp.lt.s32.totalorder %s892_s27, %s892_s27 }
  0x28   : > { %p895_p10 = pnand %p893_p9, %p881_p13  ;;  %p902_p8 = por %p901_p4, %p900_p1 }
  0x2a   : > { %p896_p6 = pneg %p895_p10 }
  0x2c   : > { %p903_p2 = pnand %p902_p8, %p896_p6 }
  0x2e   : > { %906 = shalt.err (!%p903_p2)
}
  0x2f   : > { %s1026_s28 = smov 64   ;;  %s1027_s10 = smov 4  }
  0x30   : > { %795 = dma.hbm_to_vmem [thread:$0]  (!%p1131_p11), %s1323_s1, 2048, %s220_s11, [#allocation7], %s1026_s28, %s1026_s28, %s1027_s10  }
  0x31   : > { %p37_p1 = scmp.ge.s32.totalorder %s35_s13, 2  ;;  %s44_s16 = sadd.s32 1, %s1011_s23 }
  0x32   : > { %p51_p2 = scmp.ne.s32.totalorder %s1011_s23, %s1007_s22  ;;  %p52_p4 = scmp.eq.s32.totalorder %s1023_s26, 0 }
  0x33   : > { %s1339_s13 = smov (%p37_p1, %s35_s13), 0  ;;  %p1325_p8 = scmp.ne.s32.totalorder %s1318_s30, 0 }
  0x34   : > { %p1158_p6 = por %p52_p4, %p51_p2  ;;  %s39_s12 = ssub.s32 %s1019_s25, %s1339_s13 }
  0x35   : > { %p1164_p10 = por %p1325_p8, %p51_p2  ;;  %p805_p12 = scmp.lt.s32.totalorder %s1023_s26, 2 }
  0x36   : > { %p42_p11 = scmp.eq.s32.totalorder %s39_s12, 0  ;;  %s245_s11 = sand.u32 1, %s1011_s23  }
  0x37   : > { %s716_s19 = sshll.u32 %s245_s11, 4  ;;  %s745_s27 = sshll.u32 %s1019_s25, 8 }
  0x38   : > { %s1173_s20 = scalar_select %p42_p11, %s1011_s23, %s44_s16  }
  0x39   : > { %s1179_s14 = scalar_lea.hbm %s1305_s0, %s745_s27  ;;  %s249_s30 = scalar_lea.vmem [#allocation3], %s716_s19 }
  0x3a   : > { %s259_s15 = sshll.u32 %s249_s30, 4  ;;  %p1185_p13 = pnand %p805_p12, %p1158_p6  ;;  %s1181_s15 = int_to_ptr.vmem [resolvable:$true] %s259_s15 }
  0x3b   : > { %s246_s16 = scalar_lea.sflag [#allocation4], %s245_s11  ;;  %s907_s1 = scalar_lea.hbm %s1179_s14, 256 }
  0x3c   : > { %p908_p0 = scmp.ne.s32.totalorder %s1179_s14, %s907_s1  ;;  %p909_p3 = pneg %p1185_p13 }
  0x3d   : > { %s912_s28 = scalar_lea.hbm %s1305_s0, 512  ;;  %p913_p9 = scmp.lt.u32.totalorder %s1179_s14, %s1305_s0 }
  0x3e   : > { %p910_p5 = pnand %p909_p3, %p908_p0  ;;  %p914_p1 = scmp.lt.u32.totalorder %s912_s28, %s907_s1 }
  0x3f   : > { %p916_p4 = scmp.lt.u32.totalorder %s907_s1, %s1179_s14 }
  0x40   : > { %p911_p7 = pneg %p910_p5  ;;  %p915_p2 = por %p914_p1, %p913_p9 }
  0x42   : > { %p917_p6 = por %p916_p4, %p915_p2 }
  0x44   : > { %p918_p8 = pnand %p917_p6, %p911_p7 }
  0x46   : > { %921 = shalt.err (!%p918_p8)
}
  0x47   : > { %s922_s11 = scalar_lea.vmem %s1181_s15, 256  ;;  %s1028_s30 = smov [#allocation3]  }
  0x48   : > { %p923_p12 = scmp.ne.s32.totalorder %s1181_s15, %s922_s11  ;;  %s927_s19 = sshll.u32 %s1028_s30, 4  ;;  %s928_s19 = int_to_ptr.vmem [resolvable:$false] %s927_s19 }
  0x49   : > { %s929_s27 = scalar_lea.vmem %s928_s19, 512  ;;  %p930_p5 = scmp.lt.s32.totalorder %s1181_s15, %s928_s19 }
  0x4a   : > { %p925_p11 = pnand %p923_p12, %p909_p3  ;;  %p931_p9 = scmp.lt.s32.totalorder %s929_s27, %s922_s11 }
  0x4c   : > { %p926_p0 = pneg %p925_p11  ;;  %p932_p1 = por %p931_p9, %p930_p5 }
  0x4e   : > { %p933_p2 = pnand %p932_p1, %p926_p0 }
  0x50   : > { %936 = shalt.err (!%p933_p2)
}
  0x51   : > { %799 = dma.hbm_to_vmem [thread:$0]  (!%p1185_p13), %s1179_s14, 256, %s1181_s15, %s246_s16  }
  0x52   : > { %p1328_p7 = scmp.ne.s32.totalorder %s1321_s9, 0 }
  0x53   : > { %s1217_s1 = sand.u32 (!%p1328_p7), 1, %s1007_s22   ;;  %p1329_p3 = scmp.ne.s32.totalorder (!%p1328_p7), %s1319_s7, 0 }
  0x54   : > { %268 = sbr.rel (%p1328_p7) target bundleno = 801 (0x321), region = 44  ;;  %s720_s28 = sshll.u32 (!%p1328_p7), %s1217_s1, 4 }
  0x55   : > { %s271_s17 = scalar_lea.sflag (!%p1328_p7), [#allocation4], %s1217_s1  ;;  %s1221_s10 = scalar_lea.vmem (!%p1328_p7), [#allocation3], %s720_s28 }
  0x5b   : > { %990 = dma.done.wait (%p1329_p3), %s271_s17, 256  }
  0x5c   : > { %992 = vsyncadd (%p1329_p3), %s271_s17, 4294967040  ;;  %p1330_p13 = scmp.ne.s32.totalorder %s1317_s29, 0 }
  0x5e   : > { %994 = dma.done.wait (%p1330_p13), [#allocation7], 2048  }
  0x5f   : > { %996 = vsyncadd (%p1330_p13), [#allocation7], 4294965248  ;;  %v863_v0 = vld [vmem:[#allocation6 + $0x40] sm:$0xff]   ;;  %v865_v2 = vld [vmem:[#allocation6 + $0x48] sm:$0xff]   ;;  %v1029_v20 = vmov 0.0   ;;  %vm1030_vm0 = vmmov 0  }
  0x60   : > { %v864_v1 = vld [vmem:[#allocation6] sm:$0xff]   ;;  %746 = vmatprep.subr.bf16.mxu0 %v863_v0  ;;  %v866_v3 = vld [vmem:[#allocation6 + $0x8] sm:$0xff]   ;;  %v867_v4 = vld [vmem:[#allocation6 + $0x50] sm:$0xff]   ;;  %772 = vmatprep.subr.bf16.mxu1 %v1029_v20  ;;  %v1031_v22 = vmov 0   ;;  %vm506_vm1 = vcmask 1043456   ;;  %vm502_vm2 = vcmask 64512  }
  0x61   : > { %747 = vmatpush3.bf16.msra.mxu0 %v864_v1  ;;  %v868_v5 = vld [vmem:[#allocation6 + $0x10] sm:$0xff]   ;;  %v869_v6 = vld [vmem:[#allocation6 + $0x58] sm:$0xff]   ;;  %v871_v8 = vld [vmem:[#allocation6 + $0x60] sm:$0xff]   ;;  %774 = vmatprep.mubr.msk.bf16.mxu1 %vm1030_vm0, %v1029_v20  ;;  %s722_s30 = sshll.u32 %s1217_s1, 2  ;;  %s742_s19 = sshll.u32 %s1015_s24, 6 }
  0x62   : > { %748 = vmatprep.subr.bf16.mxu0 %v865_v2  ;;  %v870_v7 = vld [vmem:[#allocation6 + $0x18] sm:$0xff]   ;;  %v872_v9 = vld [vmem:[#allocation6 + $0x20] sm:$0xff]   ;;  %v873_v10 = vld [vmem:[#allocation6 + $0x68] sm:$0xff]   ;;  %862 = vset.pattern.permute.xlu0 %v1031_v22  ;;  %s306_s27 = scalar_lea.vmem [#allocation8], %s722_s30  ;;  %s1256_s29 = scalar_lea.hbm %s1311_s6, %s742_s19 }
  0x63   : > { %v317_v11 = vld [vmem:[%s1221_s10 + $0x8] sm:$0xff]  ;;  %v875_v14 = vld [vmem:[#allocation6 + $0x70] sm:$0xff]   ;;  %v496_v21 = vld [vmem:[%s1308_s3] sm:$0xff]  ;;  %s618_s28 = sshll.u32 %s306_s27, 4  ;;  %s605_s7 = scalar_lea.sflag [#allocation5], %s1217_s1  ;;  %s1258_s28 = int_to_ptr.vmem [resolvable:$true] %s618_s28 }
  0x64   : > { %v319_v12 = vpack.c.bf16 %v317_v11, %v317_v11  ;;  %v874_v13 = vld [vmem:[#allocation6 + $0x28] sm:$0xff]   ;;  %v876_v15 = vld [vmem:[#allocation6 + $0x30] sm:$0xff]   ;;  %v877_v16 = vld [vmem:[#allocation6 + $0x78] sm:$0xff]   ;;  %499 = vperm.xlu0 %862, %v496_v21   ;;  %s937_s24 = scalar_lea.vmem %s1258_s28, 64  ;;  %s1032_s9 = smov [#allocation8]  }
  0x65   : > { %749 = vmatpush3.bf16.msra.mxu0 %v866_v3  ;;  %v878_v17 = vld [vmem:[#allocation6 + $0x38] sm:$0xff]   ;;  %v316_v18 = vld [vmem:[%s1221_s10] sm:$0xff]  ;;  %p938_p4 = scmp.ne.s32.totalorder %s1258_s28, %s937_s24  ;;  %s941_s14 = sshll.u32 %s1032_s9, 4  ;;  %s942_s14 = int_to_ptr.vmem [resolvable:$false] %s941_s14 }
  0x66   : > { %750 = vmatprep.subr.bf16.mxu0 %v867_v4  ;;  %480 = vmatprep.mubr.bf16.mxu0 %v319_v12  ;;  %v318_v19 = vpack.c.bf16 %v316_v18, %v316_v18  ;;  %v495_v30 = vld [vmem:[%s1307_s2] sm:$0xf]  ;;  %s943_s15 = scalar_lea.vmem %s942_s14, 128  ;;  %p944_p12 = scmp.lt.s32.totalorder %s1258_s28, %s942_s14 }
  0x67   : > { %v551_v32 = vld [vmem:[%s1309_s4] sm:$0xf]  ;;  %p939_p6 = pnand %p938_p4, %p1164_p10  ;;  %p945_p11 = scmp.lt.s32.totalorder %s943_s15, %s937_s24 }
  0x68   : > { %v552_v35 = vunpack.c.l.bf16 %v551_v32  ;;  %v554_v43 = vld [vmem:[%s1310_s5] sm:$0xf] }
  0x69   : > { %751 = vmatpush3.bf16.msra.mxu0 %v868_v5  ;;  %p940_p8 = pneg %p939_p6  ;;  %p946_p0 = por %p945_p11, %p944_p12 }
  0x6a   : > { %752 = vmatprep.subr.bf16.mxu0 %v869_v6 }
  0x6b   : > { %p947_p5 = pnand %p946_p0, %p940_p8 }
  0x6d   : > { %753 = vmatpush3.bf16.msra.mxu0 %v870_v7 }
  0x6e   : > { %754 = vmatprep.subr.bf16.mxu0 %v871_v8 }
  0x71   : > { %755 = vmatpush3.bf16.msra.mxu0 %v872_v9 }
  0x72   : > { %756 = vmatprep.subr.bf16.mxu0 %v873_v10 }
  0x75   : > { %757 = vmatpush3.bf16.msra.mxu0 %v874_v13 }
  0x76   : > { %758 = vmatprep.subr.bf16.mxu0 %v875_v14 }
  0x79   : > { %759 = vmatpush3.bf16.msra.mxu0 %v876_v15 }
  0x7a   : > { %760 = vmatprep.subr.bf16.mxu0 %v877_v16 }
  0x7d   : > { %761 = vmatpush3.bf16.msra.mxu0 %v878_v17 }
  0x80   : > { %481 = vmatmul.mubr.bf16.vlgmr.msra.gmra.mrb[0].mxu0 %v318_v19 }
  0xe3   : > { %v500_v31 = vpop.permute.xlu0 %499 }
 0x153   : > { %v762_v23 = vpop.f32.mrb[0].mxu0 }
 0x154   : > { %v763_v24 = vpop.f32.mrb[1].mxu0 }
 0x155   : > { %v764_v25 = vadd.f32 %v763_v24, %v762_v23  ;;  %v765_v26 = vpop.f32.mrb[2].mxu0 }
 0x156   : > { %v766_v27 = vpop.f32.mrb[3].mxu0 }
 0x157   : > { %v494_v28 = vpack.c.bf16 %v764_v25, %v764_v25 }
 0x159   : > { %v508_v29 = vsel %vm506_vm1, %v494_v28, 0 }
 0x15a   : > { %773 = vmatpush3.bf16.msra.mxu1 %v508_v29 }
 0x15b   : > { %778 = vmatprep.subr.bf16.mxu1 %v1029_v20 }
 0x15d   : > { %775 = vmatmul.mubr.msk.bf16.vlgmr.msra.gmra.mrb[0].mxu1 %vm502_vm2, %v495_v30 }
 0x15e   : > { %780 = vmatprep.mubr.msk.bf16.mxu1 %vm1030_vm0, %v1029_v20 }
 0x230   : > { %v544_v33 = vpop.f32.mrb[0].mxu1 }
 0x231   : > { %v545_v34 = vadd.f32 %v544_v33, %v500_v31  ;;  %v776_v36 = vpop.f32.mrb[1].mxu1 }
 0x232   : > { %v547_v37 = vpop.f32.mrb[2].mxu1 }
 0x233   : > { %v550_v38 = vmax.f32 %v545_v34, 0.0  ;;  %v777_v39 = vpop.f32.mrb[3].mxu1 }
 0x235   : > { %v553_v40 = vmul.f32 %v552_v35, %v550_v38 }
 0x237   : > { %v555_v41 = vpack.c.bf16 %v553_v40, %v553_v40 }
 0x239   : > { %v560_v42 = vsel %vm506_vm1, %v555_v41, 0 }
 0x23a   : > { %779 = vmatpush3.bf16.msra.mxu1 %v560_v42 }
 0x23d   : > { %781 = vmatmul.mubr.msk.bf16.vlgmr.msra.gmra.mrb[4].mxu1 %vm502_vm2, %v554_v43 }
 0x310   : > { %v596_v44 = vpop.f32.mrb[4].mxu1 }
 0x311   : > { %v602_v45 = vpack.c.bf16 %v596_v44, %v596_v44  ;;  %v782_v46 = vpop.f32.mrb[5].mxu1 }
 0x312   : > { %v599_v47 = vpop.f32.mrb[6].mxu1 }
 0x313   : > { %603 = vst [vmem:[%s306_s27] sm:$0xf] %v602_v45  ;;  %v783_v48 = vpop.f32.mrb[7].mxu1 }
 0x314   : > { %950 = shalt.err (!%p947_p5)
}
 0x315   : > { %s951_s1 = scalar_lea.hbm %s1256_s29, 64  ;;  %s955_s11 = scalar_lea.hbm %s1311_s6, 128 }
 0x316   : > { %p952_p9 = scmp.ne.s32.totalorder %s1256_s29, %s951_s1  ;;  %p956_p7 = scmp.lt.u32.totalorder %s1256_s29, %s1311_s6 }
 0x317   : > { %p957_p3 = scmp.lt.u32.totalorder %s955_s11, %s951_s1  ;;  %p959_p4 = scmp.lt.u32.totalorder %s951_s1, %s1256_s29 }
 0x318   : > { %p953_p1 = pnand %p952_p9, %p1164_p10 }
 0x319   : > { %p958_p13 = por %p957_p3, %p956_p7 }
 0x31a   : > { %p954_p2 = pneg %p953_p1 }
 0x31b   : > { %p960_p6 = por %p959_p4, %p958_p13 }
 0x31d   : > { %p961_p8 = pnand %p960_p6, %p954_p2 }
 0x31f   : > { %964 = shalt.err (!%p961_p8)
}
 0x320   : > { %790 = dma.vmem_to_hbm [thread:$0]  (%p1164_p10), %s1258_s28, 64, %s1256_s29, %s605_s7  }
 0x321 PF: > { %s630_s27 = sand.u32 1, %s1003_s21   ;;  %p1331_p12 = scmp.ne.s32.totalorder %s1320_s8, 0 }
 0x322   : > { %p1332_p11 = scmp.ge.s32.totalorder %s1023_s26, 2  ;;  %s631_s17 = scalar_lea.sflag [#allocation5], %s630_s27 }
 0x324   : > { %p801_p0 = pnand %p1332_p11, %p1331_p12 }
 0x326   : > { %998 = dma.done.wait (!%p801_p0), %s631_s17, 64  }
 0x327   : > { %1000 = vsyncadd (!%p801_p0), %s631_s17, 4294967232  ;;  %s23_s26 = sadd.s32 1, %s1023_s26   ;;  %s1333_s21 = smov %s1007_s22 }
 0x328   : > { %p20_p5 = scmp.ge.s32.totalorder %s23_s26, 4   ;;  %s1334_s22 = smov %s1011_s23 }
 0x329   : > { %s1335_s23 = smov %s1173_s20  ;;  %s1336_s24 = smov %s1019_s25 }
 0x32a   : > { %s1337_s25 = smov %s1339_s13  ;;  %22 = sbr.rel (!%p20_p5) target bundleno = 9 (0x9), region = 102 }
 0x331   :  { %636 = vsyncpa [#allocation4], 1 }
 0x332   :  { %638 = vsyncpa [#allocation4 + $0x1], 1 }
 0x333   :  { %639 = vsyncpa [#allocation7], 1 }
 0x334   :  { %640 = vsyncpa [#allocation5], 1 }
 0x335   :  { %642 = vsyncpa [#allocation5 + $0x1], 1 }

// kernel: tpu_custom_call.1
= control target key start
LH: loop header
LB: loop body
LE: loop exit
PB: predicated region body
PF: predicated region fallthrough
CT: control target
= control target key end

     0   :  { %s1305_s0 = inlined_call_operand.hbm [shape: f32[2,8,256], index: 0, kind: input, shape index: {}]   ;;  %s1306_s1 = inlined_call_operand.hbm [shape: bf16[256,128], index: 1, kind: input, shape index: {}]   ;;  %s1307_s2 = inlined_call_operand.vmem [shape: bf16[8,8], index: 2, kind: input, shape index: {}]   ;;  %s1308_s3 = inlined_call_operand.vmem [shape: f32[8,1], index: 3, kind: input, shape index: {}]   ;;  %s1309_s4 = inlined_call_operand.vmem [shape: bf16[8,128], index: 4, kind: input, shape index: {}]   ;;  %s1310_s5 = inlined_call_operand.vmem [shape: bf16[8,8], index: 5, kind: input, shape index: {}]   ;;  %s1311_s6 = inlined_call_operand.hbm [shape: bf16[2,8,128], index: 6, kind: output, shape index: {}]  }
   0x1   :  { %1316 = sst [smem:[#allocation12_spill]] %s1306_s1 }
   0x2   :  { %11 = vsyncpa [#allocation4], 0 }
   0x3   :  { %13 = vsyncpa [#allocation4 + $0x1], 0 }
   0x4   :  { %14 = vsyncpa [#allocation7], 0 }
   0x5   :  { %15 = vsyncpa [#allocation5], 0 }
   0x6   :  { %17 = vsyncpa [#allocation5 + $0x1], 0  ;;  %s1068_s21 = smov 0   ;;  %s1070_s22 = smov 0  }
   0x7   :  { %s1072_s23 = smov 0   ;;  %s1074_s24 = smov 0  }
   0x8   :  { %s1076_s25 = smov 0   ;;  %s1078_s26 = smov 0  }
   0x9 LB: > { %s711_s27 = sadd.s32 4294967295, %s1023_s26   ;;  %s712_s28 = sadd.s32 4294967294, %s1023_s26   ;;  %s1023_s26 = sphi %s1078_s26, %s23_s26   ;;  %s1019_s25 = sphi %s1076_s25, %s1337_s25   ;;  %s1015_s24 = sphi %s1074_s24, %s1336_s24   ;;  %s1011_s23 = sphi %s1072_s23, %s1335_s23   ;;  %s1007_s22 = sphi %s1070_s22, %s1334_s22   ;;  %s1003_s21 = sphi %s1068_s21, %s1333_s21  }
   0xa   : > { %p57_p0 = scmp.ne.s32.totalorder %s1007_s22, %s1003_s21  ;;  %p1102_p1 = scmp.eq.s32.totalorder %s711_s27, 0 }
   0xb   : > { %p1106_p2 = scmp.eq.s32.totalorder %s711_s27, 1  ;;  %p197_p3 = scmp.eq.s32.totalorder %s712_s28, 1 }
   0xc   : > { %s1317_s29 = scalar_select %p1102_p1, 1, 0 }
   0xd   : > { %s1318_s30 = scalar_select %p1106_p2, 1, 0 }
   0xe   : > { %p1112_p4 = por %p1102_p1, %p57_p0  ;;  %p713_p5 = scmp.ge.s32.totalorder %s1023_s26, 1 }
   0xf   : > { %p1117_p6 = por %p197_p3, %p57_p0  ;;  %p204_p7 = scmp.lt.s32.totalorder %s1023_s26, 3 }
  0x10   : > { %s1319_s7 = scalar_select %p1112_p4, 1, 0 }
  0x11   : > { %s1320_s8 = scalar_select %p1117_p6, 1, 0 }
  0x12   : > { %p1122_p8 = pnand %p713_p5, %p204_p7  ;;  %s1025_s10 = smov [#allocation6]  }
  0x13   : > { %s219_s11 = sshll.u32 %s1025_s10, 4  ;;  %s35_s13 = sadd.s32 1, %s1019_s25  ;;  %s220_s11 = int_to_ptr.vmem [resolvable:$true] %s219_s11 }
  0x14   : > { %s1321_s9 = scalar_select %p1122_p8, 1, 0 }
  0x15   : > { %p792_p9 = pneg %p1122_p8  ;;  %s1323_s1 = sld [smem:[#allocation12_spill]] }
  0x17   : > { %p1131_p11 = pnand %p792_p9, %p1102_p1 }
  0x19   : > { %p881_p13 = pneg %p1131_p11 }
  0x1b   : > { %s879_s16 = scalar_lea.hbm %s1323_s1, 2048 }
  0x1c   : > { %p880_p12 = scmp.ne.s32.totalorder %s1323_s1, %s879_s16  ;;  %p886_p5 = scmp.lt.u32.totalorder %s879_s16, %s1323_s1 }
  0x1e   : > { %p882_p0 = pnand %p881_p13, %p880_p12 }
  0x20   : > { %p883_p3 = pneg %p882_p0 }
  0x22   : > { %p888_p7 = pnand %p886_p5, %p883_p3 }
  0x24   : > { %891 = shalt.err (!%p888_p7)
}
  0x25   : > { %s892_s27 = scalar_lea.vmem %s220_s11, 2048  ;;  %p900_p1 = scmp.lt.s32.totalorder %s220_s11, %s220_s11 }
  0x26   : > { %p893_p9 = scmp.ne.s32.totalorder %s220_s11, %s892_s27  ;;  %p901_p4 = scmp.lt.s32.totalorder %s892_s27, %s892_s27 }
  0x28   : > { %p895_p10 = pnand %p893_p9, %p881_p13  ;;  %p902_p8 = por %p901_p4, %p900_p1 }
  0x2a   : > { %p896_p6 = pneg %p895_p10 }
  0x2c   : > { %p903_p2 = pnand %p902_p8, %p896_p6 }
  0x2e   : > { %906 = shalt.err (!%p903_p2)
}
  0x2f   : > { %s1026_s28 = smov 64   ;;  %s1027_s10 = smov 4  }
  0x30   : > { %795 = dma.hbm_to_vmem [thread:$0]  (!%p1131_p11), %s1323_s1, 2048, %s220_s11, [#allocation7], %s1026_s28, %s1026_s28, %s1027_s10  }
  0x31   : > { %p37_p1 = scmp.ge.s32.totalorder %s35_s13, 2  ;;  %s44_s16 = sadd.s32 1, %s1011_s23 }
  0x32   : > { %p51_p2 = scmp.ne.s32.totalorder %s1011_s23, %s1007_s22  ;;  %p52_p4 = scmp.eq.s32.totalorder %s1023_s26, 0 }
  0x33   : > { %s1339_s13 = smov (%p37_p1, %s35_s13), 0  ;;  %p1325_p8 = scmp.ne.s32.totalorder %s1318_s30, 0 }
  0x34   : > { %p1158_p6 = por %p52_p4, %p51_p2  ;;  %s39_s12 = ssub.s32 %s1019_s25, %s1339_s13 }
  0x35   : > { %p1164_p10 = por %p1325_p8, %p51_p2  ;;  %p805_p12 = scmp.lt.s32.totalorder %s1023_s26, 2 }
  0x36   : > { %p42_p11 = scmp.eq.s32.totalorder %s39_s12, 0  ;;  %s245_s11 = sand.u32 1, %s1011_s23  }
  0x37   : > { %s716_s19 = sshll.u32 %s245_s11, 4  ;;  %s745_s27 = sshll.u32 %s1019_s25, 8 }
  0x38   : > { %s1173_s20 = scalar_select %p42_p11, %s1011_s23, %s44_s16  }
  0x39   : > { %s1179_s14 = scalar_lea.hbm %s1305_s0, %s745_s27  ;;  %s249_s30 = scalar_lea.vmem [#allocation3], %s716_s19 }
  0x3a   : > { %s259_s15 = sshll.u32 %s249_s30, 4  ;;  %p1185_p13 = pnand %p805_p12, %p1158_p6  ;;  %s1181_s15 = int_to_ptr.vmem [resolvable:$true] %s259_s15 }
  0x3b   : > { %s246_s16 = scalar_lea.sflag [#allocation4], %s245_s11  ;;  %s907_s1 = scalar_lea.hbm %s1179_s14, 256 }
  0x3c   : > { %p908_p0 = scmp.ne.s32.totalorder %s1179_s14, %s907_s1  ;;  %p909_p3 = pneg %p1185_p13 }
  0x3d   : > { %s912_s28 = scalar_lea.hbm %s1305_s0, 512  ;;  %p913_p9 = scmp.lt.u32.totalorder %s1179_s14, %s1305_s0 }
  0x3e   : > { %p910_p5 = pnand %p909_p3, %p908_p0  ;;  %p914_p1 = scmp.lt.u32.totalorder %s912_s28, %s907_s1 }
  0x3f   : > { %p916_p4 = scmp.lt.u32.totalorder %s907_s1, %s1179_s14 }
  0x40   : > { %p911_p7 = pneg %p910_p5  ;;  %p915_p2 = por %p914_p1, %p913_p9 }
  0x42   : > { %p917_p6 = por %p916_p4, %p915_p2 }
  0x44   : > { %p918_p8 = pnand %p917_p6, %p911_p7 }
  0x46   : > { %921 = shalt.err (!%p918_p8)
}
  0x47   : > { %s922_s11 = scalar_lea.vmem %s1181_s15, 256  ;;  %s1028_s30 = smov [#allocation3]  }
  0x48   : > { %p923_p12 = scmp.ne.s32.totalorder %s1181_s15, %s922_s11  ;;  %s927_s19 = sshll.u32 %s1028_s30, 4  ;;  %s928_s19 = int_to_ptr.vmem [resolvable:$false] %s927_s19 }
  0x49   : > { %s929_s27 = scalar_lea.vmem %s928_s19, 512  ;;  %p930_p5 = scmp.lt.s32.totalorder %s1181_s15, %s928_s19 }
  0x4a   : > { %p925_p11 = pnand %p923_p12, %p909_p3  ;;  %p931_p9 = scmp.lt.s32.totalorder %s929_s27, %s922_s11 }
  0x4c   : > { %p926_p0 = pneg %p925_p11  ;;  %p932_p1 = por %p931_p9, %p930_p5 }
  0x4e   : > { %p933_p2 = pnand %p932_p1, %p926_p0 }
  0x50   : > { %936 = shalt.err (!%p933_p2)
}
  0x51   : > { %799 = dma.hbm_to_vmem [thread:$0]  (!%p1185_p13), %s1179_s14, 256, %s1181_s15, %s246_s16  }
  0x52   : > { %p1328_p7 = scmp.ne.s32.totalorder %s1321_s9, 0 }
  0x53   : > { %s1217_s1 = sand.u32 (!%p1328_p7), 1, %s1007_s22   ;;  %p1329_p3 = scmp.ne.s32.totalorder (!%p1328_p7), %s1319_s7, 0 }
  0x54   : > { %268 = sbr.rel (%p1328_p7) target bundleno = 801 (0x321), region = 44  ;;  %s720_s28 = sshll.u32 (!%p1328_p7), %s1217_s1, 4 }
  0x55   : > { %s271_s17 = scalar_lea.sflag (!%p1328_p7), [#allocation4], %s1217_s1  ;;  %s1221_s10 = scalar_lea.vmem (!%p1328_p7), [#allocation3], %s720_s28 }
  0x5b   : > { %990 = dma.done.wait (%p1329_p3), %s271_s17, 256  }
  0x5c   : > { %992 = vsyncadd (%p1329_p3), %s271_s17, 4294967040  ;;  %p1330_p13 = scmp.ne.s32.totalorder %s1317_s29, 0 }
  0x5e   : > { %994 = dma.done.wait (%p1330_p13), [#allocation7], 2048  }
  0x5f   : > { %996 = vsyncadd (%p1330_p13), [#allocation7], 4294965248  ;;  %v863_v0 = vld [vmem:[#allocation6 + $0x40] sm:$0xff]   ;;  %v865_v2 = vld [vmem:[#allocation6 + $0x48] sm:$0xff]   ;;  %v1029_v20 = vmov 0.0   ;;  %vm1030_vm0 = vmmov 0  }
  0x60   : > { %v864_v1 = vld [vmem:[#allocation6] sm:$0xff]   ;;  %746 = vmatprep.subr.bf16.mxu0 %v863_v0  ;;  %v866_v3 = vld [vmem:[#allocation6 + $0x8] sm:$0xff]   ;;  %v867_v4 = vld [vmem:[#allocation6 + $0x50] sm:$0xff]   ;;  %772 = vmatprep.subr.bf16.mxu1 %v1029_v20  ;;  %v1031_v22 = vmov 0   ;;  %vm506_vm1 = vcmask 1043456   ;;  %vm502_vm2 = vcmask 64512  }
  0x61   : > { %747 = vmatpush3.bf16.msra.mxu0 %v864_v1  ;;  %v868_v5 = vld [vmem:[#allocation6 + $0x10] sm:$0xff]   ;;  %v869_v6 = vld [vmem:[#allocation6 + $0x58] sm:$0xff]   ;;  %v871_v8 = vld [vmem:[#allocation6 + $0x60] sm:$0xff]   ;;  %774 = vmatprep.mubr.msk.bf16.mxu1 %vm1030_vm0, %v1029_v20  ;;  %s722_s30 = sshll.u32 %s1217_s1, 2  ;;  %s742_s19 = sshll.u32 %s1015_s24, 6 }
  0x62   : > { %748 = vmatprep.subr.bf16.mxu0 %v865_v2  ;;  %v870_v7 = vld [vmem:[#allocation6 + $0x18] sm:$0xff]   ;;  %v872_v9 = vld [vmem:[#allocation6 + $0x20] sm:$0xff]   ;;  %v873_v10 = vld [vmem:[#allocation6 + $0x68] sm:$0xff]   ;;  %862 = vset.pattern.permute.xlu0 %v1031_v22  ;;  %s306_s27 = scalar_lea.vmem [#allocation8], %s722_s30  ;;  %s1256_s29 = scalar_lea.hbm %s1311_s6, %s742_s19 }
  0x63   : > { %v317_v11 = vld [vmem:[%s1221_s10 + $0x8] sm:$0xff]  ;;  %v875_v14 = vld [vmem:[#allocation6 + $0x70] sm:$0xff]   ;;  %v496_v21 = vld [vmem:[%s1308_s3] sm:$0xff]  ;;  %s618_s28 = sshll.u32 %s306_s27, 4  ;;  %s605_s7 = scalar_lea.sflag [#allocation5], %s1217_s1  ;;  %s1258_s28 = int_to_ptr.vmem [resolvable:$true] %s618_s28 }
  0x64   : > { %v319_v12 = vpack.c.bf16 %v317_v11, %v317_v11  ;;  %v874_v13 = vld [vmem:[#allocation6 + $0x28] sm:$0xff]   ;;  %v876_v15 = vld [vmem:[#allocation6 + $0x30] sm:$0xff]   ;;  %v877_v16 = vld [vmem:[#allocation6 + $0x78] sm:$0xff]   ;;  %499 = vperm.xlu0 %862, %v496_v21   ;;  %s937_s24 = scalar_lea.vmem %s1258_s28, 64  ;;  %s1032_s9 = smov [#allocation8]  }
  0x65   : > { %749 = vmatpush3.bf16.msra.mxu0 %v866_v3  ;;  %v878_v17 = vld [vmem:[#allocation6 + $0x38] sm:$0xff]   ;;  %v316_v18 = vld [vmem:[%s1221_s10] sm:$0xff]  ;;  %p938_p4 = scmp.ne.s32.totalorder %s1258_s28, %s937_s24  ;;  %s941_s14 = sshll.u32 %s1032_s9, 4  ;;  %s942_s14 = int_to_ptr.vmem [resolvable:$false] %s941_s14 }
  0x66   : > { %750 = vmatprep.subr.bf16.mxu0 %v867_v4  ;;  %480 = vmatprep.mubr.bf16.mxu0 %v319_v12  ;;  %v318_v19 = vpack.c.bf16 %v316_v18, %v316_v18  ;;  %v495_v30 = vld [vmem:[%s1307_s2] sm:$0xf]  ;;  %s943_s15 = scalar_lea.vmem %s942_s14, 128  ;;  %p944_p12 = scmp.lt.s32.totalorder %s1258_s28, %s942_s14 }
  0x67   : > { %v551_v32 = vld [vmem:[%s1309_s4] sm:$0xf]  ;;  %p939_p6 = pnand %p938_p4, %p1164_p10  ;;  %p945_p11 = scmp.lt.s32.totalorder %s943_s15, %s937_s24 }
  0x68   : > { %v552_v35 = vunpack.c.l.bf16 %v551_v32  ;;  %v554_v43 = vld [vmem:[%s1310_s5] sm:$0xf] }
  0x69   : > { %751 = vmatpush3.bf16.msra.mxu0 %v868_v5  ;;  %p940_p8 = pneg %p939_p6  ;;  %p946_p0 = por %p945_p11, %p944_p12 }
  0x6a   : > { %752 = vmatprep.subr.bf16.mxu0 %v869_v6 }
  0x6b   : > { %p947_p5 = pnand %p946_p0, %p940_p8 }
  0x6d   : > { %753 = vmatpush3.bf16.msra.mxu0 %v870_v7 }
  0x6e   : > { %754 = vmatprep.subr.bf16.mxu0 %v871_v8 }
  0x71   : > { %755 = vmatpush3.bf16.msra.mxu0 %v872_v9 }
  0x72   : > { %756 = vmatprep.subr.bf16.mxu0 %v873_v10 }
  0x75   : > { %757 = vmatpush3.bf16.msra.mxu0 %v874_v13 }
  0x76   : > { %758 = vmatprep.subr.bf16.mxu0 %v875_v14 }
  0x79   : > { %759 = vmatpush3.bf16.msra.mxu0 %v876_v15 }
  0x7a   : > { %760 = vmatprep.subr.bf16.mxu0 %v877_v16 }
  0x7d   : > { %761 = vmatpush3.bf16.msra.mxu0 %v878_v17 }
  0x80   : > { %481 = vmatmul.mubr.bf16.vlgmr.msra.gmra.mrb[0].mxu0 %v318_v19 }
  0xe3   : > { %v500_v31 = vpop.permute.xlu0 %499 }
 0x153   : > { %v762_v23 = vpop.f32.mrb[0].mxu0 }
 0x154   : > { %v763_v24 = vpop.f32.mrb[1].mxu0 }
 0x155   : > { %v764_v25 = vadd.f32 %v763_v24, %v762_v23  ;;  %v765_v26 = vpop.f32.mrb[2].mxu0 }
 0x156   : > { %v766_v27 = vpop.f32.mrb[3].mxu0 }
 0x157   : > { %v494_v28 = vpack.c.bf16 %v764_v25, %v764_v25 }
 0x159   : > { %v508_v29 = vsel %vm506_vm1, %v494_v28, 0 }
 0x15a   : > { %773 = vmatpush3.bf16.msra.mxu1 %v508_v29 }
 0x15b   : > { %778 = vmatprep.subr.bf16.mxu1 %v1029_v20 }
 0x15d   : > { %775 = vmatmul.mubr.msk.bf16.vlgmr.msra.gmra.mrb[0].mxu1 %vm502_vm2, %v495_v30 }
 0x15e   : > { %780 = vmatprep.mubr.msk.bf16.mxu1 %vm1030_vm0, %v1029_v20 }
 0x230   : > { %v544_v33 = vpop.f32.mrb[0].mxu1 }
 0x231   : > { %v545_v34 = vadd.f32 %v544_v33, %v500_v31  ;;  %v776_v36 = vpop.f32.mrb[1].mxu1 }
 0x232   : > { %v547_v37 = vpop.f32.mrb[2].mxu1 }
 0x233   : > { %v550_v38 = vmax.f32 %v545_v34, 0.0  ;;  %v777_v39 = vpop.f32.mrb[3].mxu1 }
 0x235   : > { %v553_v40 = vmul.f32 %v552_v35, %v550_v38 }
 0x237   : > { %v555_v41 = vpack.c.bf16 %v553_v40, %v553_v40 }
 0x239   : > { %v560_v42 = vsel %vm506_vm1, %v555_v41, 0 }
 0x23a   : > { %779 = vmatpush3.bf16.msra.mxu1 %v560_v42 }
 0x23d   : > { %781 = vmatmul.mubr.msk.bf16.vlgmr.msra.gmra.mrb[4].mxu1 %vm502_vm2, %v554_v43 }
 0x310   : > { %v596_v44 = vpop.f32.mrb[4].mxu1 }
 0x311   : > { %v602_v45 = vpack.c.bf16 %v596_v44, %v596_v44  ;;  %v782_v46 = vpop.f32.mrb[5].mxu1 }
 0x312   : > { %v599_v47 = vpop.f32.mrb[6].mxu1 }
 0x313   : > { %603 = vst [vmem:[%s306_s27] sm:$0xf] %v602_v45  ;;  %v783_v48 = vpop.f32.mrb[7].mxu1 }
 0x314   : > { %950 = shalt.err (!%p947_p5)
}
 0x315   : > { %s951_s1 = scalar_lea.hbm %s1256_s29, 64  ;;  %s955_s11 = scalar_lea.hbm %s1311_s6, 128 }
 0x316   : > { %p952_p9 = scmp.ne.s32.totalorder %s1256_s29, %s951_s1  ;;  %p956_p7 = scmp.lt.u32.totalorder %s1256_s29, %s1311_s6 }
 0x317   : > { %p957_p3 = scmp.lt.u32.totalorder %s955_s11, %s951_s1  ;;  %p959_p4 = scmp.lt.u32.totalorder %s951_s1, %s1256_s29 }
 0x318   : > { %p953_p1 = pnand %p952_p9, %p1164_p10 }
 0x319   : > { %p958_p13 = por %p957_p3, %p956_p7 }
 0x31a   : > { %p954_p2 = pneg %p953_p1 }
 0x31b   : > { %p960_p6 = por %p959_p4, %p958_p13 }
 0x31d   : > { %p961_p8 = pnand %p960_p6, %p954_p2 }
 0x31f   : > { %964 = shalt.err (!%p961_p8)
}
 0x320   : > { %790 = dma.vmem_to_hbm [thread:$0]  (%p1164_p10), %s1258_s28, 64, %s1256_s29, %s605_s7  }
 0x321 PF: > { %s630_s27 = sand.u32 1, %s1003_s21   ;;  %p1331_p12 = scmp.ne.s32.totalorder %s1320_s8, 0 }
 0x322   : > { %p1332_p11 = scmp.ge.s32.totalorder %s1023_s26, 2  ;;  %s631_s17 = scalar_lea.sflag [#allocation5], %s630_s27 }
 0x324   : > { %p801_p0 = pnand %p1332_p11, %p1331_p12 }
 0x326   : > { %998 = dma.done.wait (!%p801_p0), %s631_s17, 64  }
 0x327   : > { %1000 = vsyncadd (!%p801_p0), %s631_s17, 4294967232  ;;  %s23_s26 = sadd.s32 1, %s1023_s26   ;;  %s1333_s21 = smov %s1007_s22 }
 0x328   : > { %p20_p5 = scmp.ge.s32.totalorder %s23_s26, 4   ;;  %s1334_s22 = smov %s1011_s23 }
 0x329   : > { %s1335_s23 = smov %s1173_s20  ;;  %s1336_s24 = smov %s1019_s25 }
 0x32a   : > { %s1337_s25 = smov %s1339_s13  ;;  %22 = sbr.rel (!%p20_p5) target bundleno = 9 (0x9), region = 102 }
 0x331   :  { %636 = vsyncpa [#allocation4], 1 }
 0x332   :  { %638 = vsyncpa [#allocation4 + $0x1], 1 }
 0x333   :  { %639 = vsyncpa [#allocation7], 1 }
 0x334   :  { %640 = vsyncpa [#allocation5], 1 }
 0x335   :  { %642 = vsyncpa [#allocation5 + $0x1], 1 }

</bundles_post_ra>
